<compile_context>
chip_gen: v7x
topology: tpu7x:2x2x1
jax: 0.10.0
libtpu: 0.0.40
codegen_flags: <defaults>
</compile_context>

<pallas_src>
import jax
import jax.numpy as jnp
from jax.experimental import pallas as pl
from jax.experimental.pallas import tpu as pltpu


def _round_up(x, m):
    return (x + m - 1) // m * m


def _kp_pointgencon_kernel(grid_ref, w1g_ref, b1_ref, w2_ref, b2_ref,
                           w3_ref, b3_ref, w4_ref, b4_ref, t_ref, o_ref):
    # grid_ref : (1, 1, G, TN)    f32   uv-grid, points on lanes
    # w*_ref   : (1, Cout, Cin)   bf16  per-keypoint folded conv+BN weights
    # b1_ref   : (1, 1, C1, 1)    f32   per-(batch, kp) folded bias (conv1 desc part)
    # b2/b3/b4 : (1, C, 1)        f32   per-keypoint folded biases
    # t_ref    : (1, 1, out, 1)   f32   per-(batch, kp) post-tanh translation
    # o_ref    : (1, 1, out, TN)  f32
    g = grid_ref[0, 0]                                    # (G, TN) f32
    w1g = w1g_ref[0].astype(jnp.float32)                  # (C1, G)

    # Layer 1 on the VPU: contraction width is only grid_dim (tiny), so skip a
    # degenerate MXU pass.  Descriptor columns + conv/BN bias are already in b1.
    h = b1_ref[0, 0]                                      # (C1, 1)
    for gi in range(g.shape[0]):                          # unrolled, G is static
        h = h + w1g[:, gi:gi + 1] * g[gi:gi + 1, :]       # (C1, TN)
    h = jnp.maximum(h, 0.0)

    # Layers 2..4 on the MXU: bf16 operands, f32 accumulation.
    h = jnp.dot(w2_ref[0], h.astype(jnp.bfloat16),
                preferred_element_type=jnp.float32) + b2_ref[0]
    h = jnp.maximum(h, 0.0)
    h = jnp.dot(w3_ref[0], h.astype(jnp.bfloat16),
                preferred_element_type=jnp.float32) + b3_ref[0]
    h = jnp.maximum(h, 0.0)
    h = jnp.dot(w4_ref[0], h.astype(jnp.bfloat16),
                preferred_element_type=jnp.float32) + b4_ref[0]
    # tanh on EUP, translation add on VPU (free filler), lane-dense store.
    o_ref[0, 0] = (jnp.tanh(h) + t_ref[0, 0]).astype(o_ref.dtype)


def make_kpdecoder_params(key, *, num_kp, desc_dim, grid_dim=2, bottleneck=128,
                          outdim=3, eps=1e-5):
    """Per-keypoint PointGenCon params (PyTorch-equivalent shapes), BN folded
    in eval mode, conv1 split into its grid / descriptor column blocks.
    Weights stored bf16 (HBM-traffic saving), biases f32."""
    c_in = desc_dim + grid_dim
    c1, c2, c3 = bottleneck, bottleneck // 2, bottleneck // 4
    dims = [(c_in, c1), (c1, c2), (c2, c3), (c3, outdim)]
    params = {}
    for li, (ci, co) in enumerate(dims, start=1):
        key, kw, kb, kg, kbe, km, kv = jax.random.split(key, 7)
        w = jax.random.normal(kw, (num_kp, co, ci), jnp.float32) * (ci ** -0.5)
        b = jax.random.normal(kb, (num_kp, co), jnp.float32) * 0.05
        if li < 4:  # layers with BatchNorm1d (eval mode, running stats)
            gamma = 1.0 + 0.1 * jax.random.normal(kg, (num_kp, co), jnp.float32)
            beta = 0.1 * jax.random.normal(kbe, (num_kp, co), jnp.float32)
            rmean = 0.1 * jax.random.normal(km, (num_kp, co), jnp.float32)
            rvar = 1.0 + 0.1 * jax.random.uniform(kv, (num_kp, co), jnp.float32)
            s = gamma * jax.lax.rsqrt(rvar + eps)
            w = w * s[:, :, None]
            b = (b - rmean) * s + beta
        if li == 1:
            params["w1g"] = w[:, :, :grid_dim].astype(jnp.bfloat16)
            params["w1d"] = w[:, :, grid_dim:].astype(jnp.bfloat16)
            params["b1"] = b
        else:
            params[f"w{li}"] = w.astype(jnp.bfloat16)
            params[f"b{li}"] = b
    return params


def kp_decoder_forward(x, params, grid_param=None, *, grid_dim=2, indim=3,
                       pose_split=False, num_points=None, key=None, tn=1024):
    """x: (B, num_kp, [indim +] desc_dim). Returns (B, num_points, indim)."""
    B, K, _ = x.shape
    if pose_split:                       # pose_code == 'nl-noR_T'
        t = x[:, :, :indim]
        desc = x[:, :, indim:]
    else:
        t = None
        desc = x

    if grid_param is None:               # 'nonlearnable' grid: fresh uniform grid
        assert key is not None and num_points is not None
        grid_full = jax.random.uniform(key, (B, K, num_points // K, grid_dim),
                                       jnp.float32)
    else:                                 # 'learnable' grid: keep leading dim 1
        grid_full = grid_param            # (1 or B, K, P, grid_dim)
    P = grid_full.shape[2]

    w1g, w1d, b1 = params["w1g"], params["w1d"], params["b1"]
    w2, b2 = params["w2"], params["b2"]
    w3, b3 = params["w3"], params["b3"]
    w4, b4 = params["w4"], params["b4"]
    c1, G = w1g.shape[1], w1g.shape[2]
    c2, c3, outdim = w2.shape[1], w3.shape[1], w4.shape[1]

    # Fold conv1's descriptor columns (constant across the P points of a kp)
    # plus the conv/BN bias into a per-(batch, kp) bias vector.
    bias1 = jnp.einsum("kcd,bkd->bkc", w1d.astype(jnp.float32), desc,
                       precision=jax.lax.Precision.HIGHEST) + b1[None]
    bias1 = bias1.reshape(B, K, c1, 1)
    b2c = b2.reshape(K, c2, 1)
    b3c = b3.reshape(K, c3, 1)
    b4c = b4.reshape(K, outdim, 1)
    # Post-tanh translation folded into the kernel epilogue (zeros if unused).
    if t is not None:
        t_arr = t.reshape(B, K, outdim, 1).astype(jnp.float32)
    else:
        t_arr = jnp.zeros((B, K, outdim, 1), jnp.float32)

    # Points on lanes; pad P to a lane-aligned tile and strip afterwards.
    tn_eff = max(128, _round_up(min(tn, _round_up(P, 128)), 128))
    P_pad = _round_up(P, tn_eff)
    grid_t = jnp.transpose(grid_full, (0, 1, 3, 2))        # (1|B, K, G, P)
    if P_pad != P:
        grid_t = jnp.pad(grid_t, ((0, 0), (0, 0), (0, 0), (0, P_pad - P)))
    n_pt = P_pad // tn_eff
    gb = grid_t.shape[0]                                   # 1 (shared) or B

    flops = 2 * B * K * P_pad * (c1 * G + c2 * c1 + c3 * c2 + outdim * c3)
    ins = (grid_t, w1g, bias1, w2, b2c, w3, b3c, w4, b4c, t_arr)
    bytes_accessed = sum(a.size * a.dtype.itemsize for a in ins) \
        + B * K * outdim * P_pad * 4

    # Keypoint axis outermost so per-kp weight blocks are fetched once per kp
    # (block index unchanged across consecutive b / point-tile steps).
    out = pl.pallas_call(
        _kp_pointgencon_kernel,
        out_shape=jax.ShapeDtypeStruct((B, K, outdim, P_pad), jnp.float32),
        grid_spec=pltpu.PrefetchScalarGridSpec(
            num_scalar_prefetch=0,
            grid=(K, B, n_pt),
            in_specs=[
                pl.BlockSpec((1, 1, G, tn_eff),
                             lambda k, b, n: (0 if gb == 1 else b, k, 0, n)),
                pl.BlockSpec((1, c1, G),        lambda k, b, n: (k, 0, 0)),
                pl.BlockSpec((1, 1, c1, 1),     lambda k, b, n: (b, k, 0, 0)),
                pl.BlockSpec((1, c2, c1),       lambda k, b, n: (k, 0, 0)),
                pl.BlockSpec((1, c2, 1),        lambda k, b, n: (k, 0, 0)),
                pl.BlockSpec((1, c3, c2),       lambda k, b, n: (k, 0, 0)),
                pl.BlockSpec((1, c3, 1),        lambda k, b, n: (k, 0, 0)),
                pl.BlockSpec((1, outdim, c3),   lambda k, b, n: (k, 0, 0)),
                pl.BlockSpec((1, outdim, 1),    lambda k, b, n: (k, 0, 0)),
                pl.BlockSpec((1, 1, outdim, 1), lambda k, b, n: (b, k, 0, 0)),
            ],
            out_specs=pl.BlockSpec((1, 1, outdim, tn_eff),
                                   lambda k, b, n: (b, k, 0, n)),
        ),
        compiler_params=pltpu.CompilerParams(
            dimension_semantics=("parallel", "parallel", "parallel")),
        cost_estimate=pl.CostEstimate(flops=flops,
                                      transcendentals=B * K * P_pad * outdim,
                                      bytes_accessed=bytes_accessed),
    )(*ins)

    out = out[..., :P]                                     # strip pad points
    # (B, K, 3, P) -> (B, K*P, 3): matches cat(dim=2).transpose(2, 1).
    return jnp.transpose(out, (0, 1, 3, 2)).reshape(B, K * P, outdim)


def kp_decoder_reference(x, params, grid_param=None, *, grid_dim=2, indim=3,
                         pose_split=False, num_points=None, key=None):
    """Pure-JAX reference mirroring the PyTorch module (same bf16 weights)."""
    B, K, _ = x.shape
    if pose_split:
        t, desc = x[:, :, :indim], x[:, :, indim:]
    else:
        t, desc = None, x
    if grid_param is None:
        grid_full = jax.random.uniform(key, (B, K, num_points // K, grid_dim),
                                       jnp.float32)
    else:
        grid_full = jnp.broadcast_to(grid_param, (B,) + grid_param.shape[1:])
    P, D = grid_full.shape[2], desc.shape[-1]

    w1 = jnp.concatenate([params["w1g"], params["w1d"]], axis=-1).astype(jnp.float32)
    desc_e = jnp.broadcast_to(desc[:, :, None, :], (B, K, P, D))
    y = jnp.concatenate([grid_full, desc_e], axis=-1)      # (B, K, P, G+D)

    h = jnp.einsum("bkpc,koc->bkpo", y, w1,
                   precision=jax.lax.Precision.HIGHEST) + params["b1"][None, :, None, :]
    h = jnp.maximum(h, 0.0)
    h = jnp.einsum("bkpc,koc->bkpo", h.astype(jnp.bfloat16), params["w2"],
                   preferred_element_type=jnp.float32) + params["b2"][None, :, None, :]
    h = jnp.maximum(h, 0.0)
    h = jnp.einsum("bkpc,koc->bkpo", h.astype(jnp.bfloat16), params["w3"],
                   preferred_element_type=jnp.float32) + params["b3"][None, :, None, :]
    h = jnp.maximum(h, 0.0)
    h = jnp.einsum("bkpc,koc->bkpo", h.astype(jnp.bfloat16), params["w4"],
                   preferred_element_type=jnp.float32) + params["b4"][None, :, None, :]
    h = jnp.tanh(h)
    if t is not None:
        h = h + t[:, :, None, :]
    return h.reshape(B, K * P, -1)


if __name__ == "__main__":
    key = jax.random.PRNGKey(0)
    k_par, k_grid, k_x = jax.random.split(key, 3)

    B, NUM_KP, NUM_POINTS = 2, 4, 1024
    DESC_DIM, GRID_DIM, INDIM, BOTTLENECK = 64, 2, 3, 128
    P = NUM_POINTS // NUM_KP

    params = make_kpdecoder_params(k_par, num_kp=NUM_KP, desc_dim=DESC_DIM,
                                   grid_dim=GRID_DIM, bottleneck=BOTTLENECK,
                                   outdim=INDIM)
    # 'learnable' decoder grid, uniform(0, 1) like the PyTorch parameter init.
    grid_param = jax.random.uniform(k_grid, (1, NUM_KP, P, GRID_DIM), jnp.float32)
    # x = [translation | descriptor] per keypoint (pose_code == 'nl-noR_T').
    x = jax.random.normal(k_x, (B, NUM_KP, INDIM + DESC_DIM), jnp.float32)

    out = kp_decoder_forward(x, params, grid_param, grid_dim=GRID_DIM,
                             indim=INDIM, pose_split=True, tn=1024)
    out = jax.block_until_ready(out)

    ref = kp_decoder_reference(x, params, grid_param, grid_dim=GRID_DIM,
                               indim=INDIM, pose_split=True)
    assert out.shape == (B, NUM_POINTS, INDIM), out.shape
    max_err = float(jnp.max(jnp.abs(out - ref)))
    assert jnp.allclose(out, ref, atol=1e-2, rtol=1e-2), f"mismatch: {max_err}"
    print("KERNEL_OK")
</pallas_src>

<mosaic_0001>
module attributes {stable_mosaic.version = 11 : i64} {
  func.func @_kp_pointgencon_kernel(%arg0: i32, %arg1: i32, %arg2: i32, %arg3: memref<1x1x2x256xf32, #tpu.memory_space<vmem>>, %arg4: memref<1x128x2xbf16, #tpu.memory_space<vmem>>, %arg5: memref<1x1x128x1xf32, #tpu.memory_space<vmem>>, %arg6: memref<1x64x128xbf16, #tpu.memory_space<vmem>>, %arg7: memref<1x64x1xf32, #tpu.memory_space<vmem>>, %arg8: memref<1x32x64xbf16, #tpu.memory_space<vmem>>, %arg9: memref<1x32x1xf32, #tpu.memory_space<vmem>>, %arg10: memref<1x3x32xbf16, #tpu.memory_space<vmem>>, %arg11: memref<1x3x1xf32, #tpu.memory_space<vmem>>, %arg12: memref<1x1x3x1xf32, #tpu.memory_space<vmem>>, %arg13: memref<1x1x3x256xf32, #tpu.memory_space<vmem>>) attributes {dimension_semantics = [#tpu.dimension_semantics<parallel>, #tpu.dimension_semantics<parallel>, #tpu.dimension_semantics<parallel>], iteration_bounds = array<i64: 4, 2, 1>, scalar_prefetch = 0 : i64, scratch_operands = 0 : i64, tpu.core_type = #tpu.core_type<tc>, window_params = [{transform_indices = @transform_0, window_bounds = array<i64: 1, 1, 2, 256>}, {transform_indices = @transform_1, window_bounds = array<i64: 1, 128, 2>}, {transform_indices = @transform_2, window_bounds = array<i64: 1, 1, 128, 1>}, {transform_indices = @transform_3, window_bounds = array<i64: 1, 64, 128>}, {transform_indices = @transform_4, window_bounds = array<i64: 1, 64, 1>}, {transform_indices = @transform_5, window_bounds = array<i64: 1, 32, 64>}, {transform_indices = @transform_6, window_bounds = array<i64: 1, 32, 1>}, {transform_indices = @transform_7, window_bounds = array<i64: 1, 3, 32>}, {transform_indices = @transform_8, window_bounds = array<i64: 1, 3, 1>}, {transform_indices = @transform_9, window_bounds = array<i64: 1, 1, 3, 1>}, {transform_indices = @transform_10, window_bounds = array<i64: 1, 1, 3, 256>}]} {
    %c0 = arith.constant 0 : index
    %c0_0 = arith.constant 0 : index
    %c0_1 = arith.constant 0 : index
    %c0_2 = arith.constant 0 : index
    %0 = vector.load %arg3[%c0, %c0_0, %c0_1, %c0_2] : memref<1x1x2x256xf32, #tpu.memory_space<vmem>>, vector<1x1x2x256xf32>
    %1 = vector.shape_cast %0 : vector<1x1x2x256xf32> to vector<2x256xf32>
    %c0_3 = arith.constant 0 : index
    %c0_4 = arith.constant 0 : index
    %c0_5 = arith.constant 0 : index
    %2 = vector.load %arg4[%c0_3, %c0_4, %c0_5] : memref<1x128x2xbf16, #tpu.memory_space<vmem>>, vector<1x128x2xbf16>
    %3 = vector.shape_cast %2 : vector<1x128x2xbf16> to vector<128x2xbf16>
    %4 = arith.extf %3 : vector<128x2xbf16> to vector<128x2xf32>
    %c0_6 = arith.constant 0 : index
    %c0_7 = arith.constant 0 : index
    %c0_8 = arith.constant 0 : index
    %c0_9 = arith.constant 0 : index
    %5 = vector.load %arg5[%c0_6, %c0_7, %c0_8, %c0_9] : memref<1x1x128x1xf32, #tpu.memory_space<vmem>>, vector<1x1x128x1xf32>
    %6 = vector.shape_cast %5 : vector<1x1x128x1xf32> to vector<128x1xf32>
    %7 = vector.extract_strided_slice %4 {offsets = [0, 0], sizes = [128, 1], strides = [1, 1]} : vector<128x2xf32> to vector<128x1xf32>
    %8 = vector.extract_strided_slice %1 {offsets = [0, 0], sizes = [1, 256], strides = [1, 1]} : vector<2x256xf32> to vector<1x256xf32>
    %9 = vector.broadcast %7 : vector<128x1xf32> to vector<128x256xf32>
    %10 = vector.broadcast %8 : vector<1x256xf32> to vector<128x256xf32>
    %11 = arith.mulf %9, %10 : vector<128x256xf32>
    %12 = vector.broadcast %6 : vector<128x1xf32> to vector<128x256xf32>
    %13 = arith.addf %12, %11 : vector<128x256xf32>
    %14 = vector.extract_strided_slice %4 {offsets = [0, 1], sizes = [128, 1], strides = [1, 1]} : vector<128x2xf32> to vector<128x1xf32>
    %15 = vector.extract_strided_slice %1 {offsets = [1, 0], sizes = [1, 256], strides = [1, 1]} : vector<2x256xf32> to vector<1x256xf32>
    %16 = vector.broadcast %14 : vector<128x1xf32> to vector<128x256xf32>
    %17 = vector.broadcast %15 : vector<1x256xf32> to vector<128x256xf32>
    %18 = arith.mulf %16, %17 : vector<128x256xf32>
    %19 = arith.addf %13, %18 : vector<128x256xf32>
    %cst = arith.constant 0.000000e+00 : f32
    %20 = vector.broadcast %cst : f32 to vector<128x256xf32>
    %21 = arith.maximumf %19, %20 : vector<128x256xf32>
    %c0_10 = arith.constant 0 : index
    %c0_11 = arith.constant 0 : index
    %c0_12 = arith.constant 0 : index
    %22 = vector.load %arg6[%c0_10, %c0_11, %c0_12] : memref<1x64x128xbf16, #tpu.memory_space<vmem>>, vector<1x64x128xbf16>
    %23 = vector.shape_cast %22 : vector<1x64x128xbf16> to vector<64x128xbf16>
    %24 = arith.truncf %21 : vector<128x256xf32> to vector<128x256xbf16>
    %cst_13 = arith.constant dense<0.000000e+00> : vector<64x256xf32>
    %25 = tpu.matmul %23, %24, %cst_13 {dimension_numbers = #tpu.dot_dimension_numbers<[1], [0], [0], [1], [0, 0, 1, 1], [], []>} : vector<64x128xbf16>, vector<128x256xbf16>, vector<64x256xf32> -> vector<64x256xf32>
    %c0_14 = arith.constant 0 : index
    %c0_15 = arith.constant 0 : index
    %c0_16 = arith.constant 0 : index
    %26 = vector.load %arg7[%c0_14, %c0_15, %c0_16] : memref<1x64x1xf32, #tpu.memory_space<vmem>>, vector<1x64x1xf32>
    %27 = vector.shape_cast %26 : vector<1x64x1xf32> to vector<64x1xf32>
    %28 = vector.broadcast %27 : vector<64x1xf32> to vector<64x256xf32>
    %29 = arith.addf %25, %28 : vector<64x256xf32>
    %cst_17 = arith.constant 0.000000e+00 : f32
    %30 = vector.broadcast %cst_17 : f32 to vector<64x256xf32>
    %31 = arith.maximumf %29, %30 : vector<64x256xf32>
    %c0_18 = arith.constant 0 : index
    %c0_19 = arith.constant 0 : index
    %c0_20 = arith.constant 0 : index
    %32 = vector.load %arg8[%c0_18, %c0_19, %c0_20] : memref<1x32x64xbf16, #tpu.memory_space<vmem>>, vector<1x32x64xbf16>
    %33 = vector.shape_cast %32 : vector<1x32x64xbf16> to vector<32x64xbf16>
    %34 = arith.truncf %31 : vector<64x256xf32> to vector<64x256xbf16>
    %cst_21 = arith.constant dense<0.000000e+00> : vector<32x256xf32>
    %35 = tpu.matmul %33, %34, %cst_21 {dimension_numbers = #tpu.dot_dimension_numbers<[1], [0], [0], [1], [0, 0, 1, 1], [], []>} : vector<32x64xbf16>, vector<64x256xbf16>, vector<32x256xf32> -> vector<32x256xf32>
    %c0_22 = arith.constant 0 : index
    %c0_23 = arith.constant 0 : index
    %c0_24 = arith.constant 0 : index
    %36 = vector.load %arg9[%c0_22, %c0_23, %c0_24] : memref<1x32x1xf32, #tpu.memory_space<vmem>>, vector<1x32x1xf32>
    %37 = vector.shape_cast %36 : vector<1x32x1xf32> to vector<32x1xf32>
    %38 = vector.broadcast %37 : vector<32x1xf32> to vector<32x256xf32>
    %39 = arith.addf %35, %38 : vector<32x256xf32>
    %cst_25 = arith.constant 0.000000e+00 : f32
    %40 = vector.broadcast %cst_25 : f32 to vector<32x256xf32>
    %41 = arith.maximumf %39, %40 : vector<32x256xf32>
    %c0_26 = arith.constant 0 : index
    %c0_27 = arith.constant 0 : index
    %c0_28 = arith.constant 0 : index
    %42 = vector.load %arg10[%c0_26, %c0_27, %c0_28] : memref<1x3x32xbf16, #tpu.memory_space<vmem>>, vector<1x3x32xbf16>
    %43 = vector.shape_cast %42 : vector<1x3x32xbf16> to vector<3x32xbf16>
    %44 = arith.truncf %41 : vector<32x256xf32> to vector<32x256xbf16>
    %cst_29 = arith.constant dense<0.000000e+00> : vector<3x256xf32>
    %45 = tpu.matmul %43, %44, %cst_29 {dimension_numbers = #tpu.dot_dimension_numbers<[1], [0], [0], [1], [0, 0, 1, 1], [], []>} : vector<3x32xbf16>, vector<32x256xbf16>, vector<3x256xf32> -> vector<3x256xf32>
    %c0_30 = arith.constant 0 : index
    %c0_31 = arith.constant 0 : index
    %c0_32 = arith.constant 0 : index
    %46 = vector.load %arg11[%c0_30, %c0_31, %c0_32] : memref<1x3x1xf32, #tpu.memory_space<vmem>>, vector<1x3x1xf32>
    %47 = vector.shape_cast %46 : vector<1x3x1xf32> to vector<3x1xf32>
    %48 = vector.broadcast %47 : vector<3x1xf32> to vector<3x256xf32>
    %49 = arith.addf %45, %48 : vector<3x256xf32>
    %50 = math.tanh %49 : vector<3x256xf32>
    %c0_33 = arith.constant 0 : index
    %c0_34 = arith.constant 0 : index
    %c0_35 = arith.constant 0 : index
    %c0_36 = arith.constant 0 : index
    %51 = vector.load %arg12[%c0_33, %c0_34, %c0_35, %c0_36] : memref<1x1x3x1xf32, #tpu.memory_space<vmem>>, vector<1x1x3x1xf32>
    %52 = vector.shape_cast %51 : vector<1x1x3x1xf32> to vector<3x1xf32>
    %53 = vector.broadcast %52 : vector<3x1xf32> to vector<3x256xf32>
    %54 = arith.addf %50, %53 : vector<3x256xf32>
    %c0_37 = arith.constant 0 : index
    %c0_38 = arith.constant 0 : index
    %c0_39 = arith.constant 0 : index
    %c0_40 = arith.constant 0 : index
    %55 = vector.load %arg13[%c0_37, %c0_38, %c0_39, %c0_40] : memref<1x1x3x256xf32, #tpu.memory_space<vmem>>, vector<1x1x3x256xf32>
    %56 = vector.shape_cast %55 : vector<1x1x3x256xf32> to vector<3x256xf32>
    %57 = vector.shape_cast %54 : vector<3x256xf32> to vector<1x1x3x256xf32>
    tpu.vector_store %arg13[%c0_37, %c0_38, %c0_39, %c0_40], %57 {strides = array<i32>} : memref<1x1x3x256xf32, #tpu.memory_space<vmem>>, vector<1x1x3x256xf32>,
    return
  }
  func.func @transform_0(%arg0: i32, %arg1: i32, %arg2: i32) -> (i32, i32, i32, i32) {
    %c0_i32 = arith.constant 0 : i32
    %c0_i32_0 = arith.constant 0 : i32
    %c0_i32_1 = arith.constant 0 : i32
    return %c0_i32, %arg0, %c0_i32_0, %arg2 : i32, i32, i32, i32
  }
  func.func @transform_1(%arg0: i32, %arg1: i32, %arg2: i32) -> (i32, i32, i32) {
    %c0_i32 = arith.constant 0 : i32
    %c0_i32_0 = arith.constant 0 : i32
    %c0_i32_1 = arith.constant 0 : i32
    return %arg0, %c0_i32, %c0_i32_0 : i32, i32, i32
  }
  func.func @transform_2(%arg0: i32, %arg1: i32, %arg2: i32) -> (i32, i32, i32, i32) {
    %c0_i32 = arith.constant 0 : i32
    %c0_i32_0 = arith.constant 0 : i32
    %c0_i32_1 = arith.constant 0 : i32
    return %arg1, %arg0, %c0_i32, %c0_i32_0 : i32, i32, i32, i32
  }
  func.func @transform_3(%arg0: i32, %arg1: i32, %arg2: i32) -> (i32, i32, i32) {
    %c0_i32 = arith.constant 0 : i32
    %c0_i32_0 = arith.constant 0 : i32
    %c0_i32_1 = arith.constant 0 : i32
    return %arg0, %c0_i32, %c0_i32_0 : i32, i32, i32
  }
  func.func @transform_4(%arg0: i32, %arg1: i32, %arg2: i32) -> (i32, i32, i32) {
    %c0_i32 = arith.constant 0 : i32
    %c0_i32_0 = arith.constant 0 : i32
    %c0_i32_1 = arith.constant 0 : i32
    return %arg0, %c0_i32, %c0_i32_0 : i32, i32, i32
  }
  func.func @transform_5(%arg0: i32, %arg1: i32, %arg2: i32) -> (i32, i32, i32) {
    %c0_i32 = arith.constant 0 : i32
    %c0_i32_0 = arith.constant 0 : i32
    %c0_i32_1 = arith.constant 0 : i32
    return %arg0, %c0_i32, %c0_i32_0 : i32, i32, i32
  }
  func.func @transform_6(%arg0: i32, %arg1: i32, %arg2: i32) -> (i32, i32, i32) {
    %c0_i32 = arith.constant 0 : i32
    %c0_i32_0 = arith.constant 0 : i32
    %c0_i32_1 = arith.constant 0 : i32
    return %arg0, %c0_i32, %c0_i32_0 : i32, i32, i32
  }
  func.func @transform_7(%arg0: i32, %arg1: i32, %arg2: i32) -> (i32, i32, i32) {
    %c0_i32 = arith.constant 0 : i32
    %c0_i32_0 = arith.constant 0 : i32
    %c0_i32_1 = arith.constant 0 : i32
    return %arg0, %c0_i32, %c0_i32_0 : i32, i32, i32
  }
  func.func @transform_8(%arg0: i32, %arg1: i32, %arg2: i32) -> (i32, i32, i32) {
    %c0_i32 = arith.constant 0 : i32
    %c0_i32_0 = arith.constant 0 : i32
    %c0_i32_1 = arith.constant 0 : i32
    return %arg0, %c0_i32, %c0_i32_0 : i32, i32, i32
  }
  func.func @transform_9(%arg0: i32, %arg1: i32, %arg2: i32) -> (i32, i32, i32, i32) {
    %c0_i32 = arith.constant 0 : i32
    %c0_i32_0 = arith.constant 0 : i32
    %c0_i32_1 = arith.constant 0 : i32
    return %arg1, %arg0, %c0_i32, %c0_i32_0 : i32, i32, i32, i32
  }
  func.func @transform_10(%arg0: i32, %arg1: i32, %arg2: i32) -> (i32, i32, i32, i32) {
    %c0_i32 = arith.constant 0 : i32
    %c0_i32_0 = arith.constant 0 : i32
    return %arg1, %arg0, %c0_i32, %arg2 : i32, i32, i32, i32
  }
}

</mosaic_0001>

<bundles_post_ra>
// kernel: tpu_custom_call.1
= control target key start
LH: loop header
LB: loop body
LE: loop exit
PB: predicated region body
PF: predicated region fallthrough
CT: control target
= control target key end

     0   :  { %s2018_s13 = smov 0   ;;  %s2020_s14 = smov 0   ;;  %s2272_s0 = inlined_call_operand.vmem [shape: f32[1,4,2,256], index: 0, kind: input, shape index: {}]   ;;  %s2273_s1 = inlined_call_operand.vmem [shape: bf16[4,128,2], index: 1, kind: input, shape index: {}]   ;;  %s2274_s2 = inlined_call_operand.vmem [shape: f32[2,4,128,1], index: 2, kind: input, shape index: {}]   ;;  %s2275_s3 = inlined_call_operand.vmem [shape: bf16[4,64,128], index: 3, kind: input, shape index: {}]   ;;  %s2276_s4 = inlined_call_operand.vmem [shape: f32[4,64,1], index: 4, kind: input, shape index: {}]   ;;  %s2277_s5 = inlined_call_operand.vmem [shape: bf16[4,32,64], index: 5, kind: input, shape index: {}]   ;;  %s2278_s6 = inlined_call_operand.vmem [shape: f32[4,32,1], index: 6, kind: input, shape index: {}]   ;;  %s2279_s7 = inlined_call_operand.vmem [shape: bf16[4,3,32], index: 7, kind: input, shape index: {}]   ;;  %s2280_s8 = inlined_call_operand.vmem [shape: f32[4,3,1], index: 8, kind: input, shape index: {}]   ;;  %s2281_s9 = inlined_call_operand.vmem [shape: f32[2,4,3,1], index: 9, kind: input, shape index: {}]   ;;  %s2282_s10 = inlined_call_operand.vmem [shape: f32[2,4,3,256], index: 10, kind: output, shape index: {}]  }
   0x1   :  { %s2022_s15 = smov 0   ;;  %s2024_s16 = smov 0  }
   0x2   :  { %s2026_s17 = smov 0  }
   0x3 LB: > { %s35_s18 = sadd.s32 1, %s1951_s15  ;;  %s39_s19 = sadd.s32 1, %s1955_s16  ;;  %s1959_s17 = sphi %s2026_s17, %s20_s17   ;;  %s1955_s16 = sphi %s2024_s16, %s2286_s16   ;;  %s1951_s15 = sphi %s2022_s15, %s2285_s15   ;;  %s1947_s14 = sphi %s2020_s14, %s2284_s14   ;;  %s1943_s13 = sphi %s2018_s13, %s2283_s13  }
   0x4   : > { %p37_p0 = scmp.ge.s32.totalorder %s35_s18, 2  ;;  %p1692_p1 = scmp.ge.s32.totalorder %s1959_s17, 1 }
   0x5   : > { %p441_p2 = scmp.lt.s32.totalorder %s1959_s17, 9 }
   0x6   : > { %s2288_s18 = smov (%p37_p0, %s35_s18), 0  ;;  %s2290_s19 = smov (!%p37_p0, %s39_s19), %s1955_s16 }
   0x7   : > { %p442_p3 = pnand %p1692_p1, %p441_p2  ;;  %p41_p4 = scmp.ge.s32.totalorder %s2290_s19, 4 }
   0x8   : > { %p542_p5 = scmp.lt.s32.totalorder (!%p442_p3), %s1947_s14, 3  ;;  %p556_p6 = scmp.lt.s32.totalorder (!%p442_p3), %s1943_s13, 1  ;;  %v1961_v0 = vmov (!%p442_p3), 0   ;;  %v1962_v10 = vmov (!%p442_p3), 1   ;;  %v746_v57 = vlaneseq (!%p442_p3)  ;;  %vm1317_vm0 = vcmask (!%p442_p3), 523264  }
   0x9   : > { %s2292_s19 = smov (%p41_p4, %s2290_s19), 0  ;;  %445 = sbr.rel (%p442_p3) target bundleno = 953 (0x3b9), region = 60 }
   0xa   : > { %1819 = vset.pattern.permute.xlu1 (!%p442_p3), %v1961_v0  ;;  %1813 = vset.pattern.permute.xlu0 (!%p442_p3), %v1961_v0  ;;  %v747_v59 = vshrl.u32 (!%p442_p3), %v746_v57, 7  ;;  %vm1396_vm1 = vcmask (!%p442_p3), 261120  }
   0xb   : > { %1214 = vmatprep.mubr.bf16.mxu0 (!%p442_p3), %v1961_v0  ;;  %1356 = vmatprep.mubr.bf16.mxu1 (!%p442_p3), %v1961_v0 }
   0xc   : > { %v748_v61 = vsub.s32 (!%p442_p3), 0, %v747_v59  ;;  %v752_v62 = vsub.s32 (!%p442_p3), 2, %v747_v59 }
  0x10   : > { %s2294_s14 = smov (!%p542_p5, %s1947_s14), 3  ;;  %s2296_s13 = smov (!%p556_p6, %s1943_s13), 1 }
  0x11   : > { %s1697_s20 = sshll.u32 %s2294_s14, 4  ;;  %s1727_s21 = sshll.u32 %s2294_s14, 6 }
  0x12   : > { %s1698_s22 = sshll.u32 %s2296_s13, 6  ;;  %s2064_s25 = scalar_lea.vmem %s2273_s1, %s1727_s21 }
  0x13   : > { %s562_s26 = sadd.s32 %s1698_s22, %s1697_s20  ;;  %v1733_v1 = vld [vmem:[%s2064_s25] sm:$0xff]   ;;  %v1764_v4 = vld [vmem:[%s2064_s25 + $0x8] sm:$0xff]   ;;  %s1728_s11 = sshll.u32 %s2294_s14, 5  ;;  %v1765_v13 = vld [vmem:[%s2064_s25 + $0x10] sm:$0xff]  }
  0x14   : > { %s1699_s27 = sshll.u32 %s562_s26, 3  ;;  %v1734_v2 = vunpack.c.l.bf16 %v1733_v1  ;;  %v1735_v3 = vunpack.c.h.bf16 %v1733_v1  ;;  %v1738_v7 = vunpack.c.l.bf16 %v1764_v4  ;;  %v1739_v8 = vunpack.c.h.bf16 %v1764_v4  ;;  %s2084_s23 = scalar_lea.vmem %s2275_s3, %s1728_s11  ;;  %v1766_v18 = vld [vmem:[%s2064_s25 + $0x18] sm:$0xff]   ;;  %v1767_v24 = vld [vmem:[%s2064_s25 + $0x20] sm:$0xff]   ;;  %v1768_v30 = vld [vmem:[%s2064_s25 + $0x28] sm:$0xff]  }
  0x15   : > { %s2072_s30 = scalar_lea.vmem %s2274_s2, %s1699_s27  ;;  %v1742_v14 = vunpack.c.l.bf16 %v1765_v13  ;;  %v1743_v15 = vunpack.c.h.bf16 %v1765_v13  ;;  %v1746_v20 = vunpack.c.l.bf16 %v1766_v18  ;;  %v1747_v21 = vunpack.c.h.bf16 %v1766_v18  ;;  %v1769_v36 = vld [vmem:[%s2064_s25 + $0x30] sm:$0xff]   ;;  %v1770_v41 = vld [vmem:[%s2064_s25 + $0x38] sm:$0xff]   ;;  %s2121_s26 = scalar_lea.vmem %s2276_s4, %s1727_s21 }
  0x16   : > { %v650_v5 = vld [vmem:[%s2072_s30 + $0x8] sm:$0xff]  ;;  %v1814_v6 = vpack.i.bf16 %v1735_v3, %v1734_v2  ;;  %v649_v9 = vld [vmem:[%s2072_s30] sm:$0xff]  ;;  %v1826_v11 = vpack.i.bf16 %v1739_v8, %v1738_v7  ;;  %v651_v12 = vld [vmem:[%s2072_s30 + $0x10] sm:$0xff]  ;;  %v1750_v25 = vunpack.c.l.bf16 %v1767_v24  ;;  %v1751_v26 = vunpack.c.h.bf16 %v1767_v24  ;;  %s2136_s28 = scalar_lea.vmem %s2278_s6, %s1728_s11  ;;  %s1726_s29 = sshll.u32 %s2294_s14, 2 }
  0x17   : > { %803 = vperm.xlu1 %1819, %v650_v5   ;;  %v652_v16 = vld [vmem:[%s2072_s30 + $0x18] sm:$0xff]  ;;  %v1838_v17 = vpack.i.bf16 %v1743_v15, %v1742_v14  ;;  %v653_v19 = vld [vmem:[%s2072_s30 + $0x20] sm:$0xff]  ;;  %v654_v22 = vld [vmem:[%s2072_s30 + $0x28] sm:$0xff]  ;;  %v1850_v23 = vpack.i.bf16 %v1747_v21, %v1746_v20  ;;  %v1754_v31 = vunpack.c.l.bf16 %v1768_v30  ;;  %v1755_v32 = vunpack.c.h.bf16 %v1768_v30  ;;  %s592_s22 = scalar_lea.vmem %s2280_s8, %s1726_s29  ;;  %s549_s25 = scalar_lea.vmem %s2272_s0, %s1726_s29 }
  0x18   : > { %1815 = vperm.xlu0 %1813, %v1814_v6   ;;  %v656_v27 = vld [vmem:[%s2072_s30 + $0x38] sm:$0xff]  ;;  %v655_v28 = vld [vmem:[%s2072_s30 + $0x30] sm:$0xff]  ;;  %v1862_v29 = vpack.i.bf16 %v1751_v26, %v1750_v25  ;;  %v658_v33 = vld [vmem:[%s2072_s30 + $0x48] sm:$0xff]  ;;  %v1758_v37 = vunpack.c.l.bf16 %v1769_v36  ;;  %v1759_v38 = vunpack.c.h.bf16 %v1769_v36  ;;  %v1762_v43 = vunpack.c.l.bf16 %v1770_v41  ;;  %s1710_s21 = sshll.u32 %s2296_s13, 2  ;;  %s2243_s11 = scalar_lea.vmem %s2277_s5, %s1697_s20 }
  0x19   : > { %v657_v34 = vld [vmem:[%s2072_s30 + $0x40] sm:$0xff]  ;;  %v1874_v35 = vpack.i.bf16 %v1755_v32, %v1754_v31  ;;  %v660_v39 = vld [vmem:[%s2072_s30 + $0x58] sm:$0xff]  ;;  %v659_v42 = vld [vmem:[%s2072_s30 + $0x50] sm:$0xff]  ;;  %v1763_v44 = vunpack.c.h.bf16 %v1770_v41  ;;  %v974_v2 = vsub.s32 1, %v747_v59  ;;  %v978_v3 = vsub.s32 3, %v747_v59  ;;  %s598_s27 = sadd.s32 %s1710_s21, %s2294_s14  ;;  %s1708_s20 = sshll.u32 %s2294_s14, 1 }
  0x1a   : > { %v1886_v40 = vpack.i.bf16 %v1759_v38, %v1758_v37  ;;  %v662_v45 = vld [vmem:[%s2072_s30 + $0x68] sm:$0xff]  ;;  %v661_v47 = vld [vmem:[%s2072_s30 + $0x60] sm:$0xff]  ;;  %v664_v48 = vld [vmem:[%s2072_s30 + $0x78] sm:$0xff]  ;;  %s1711_s29 = sshll.u32 %s598_s27, 2  ;;  %s1713_s14 = sshll.u32 %s2296_s13, 3 }
  0x1b   : > { %1820 = vset.pattern.permute.xlu1 %v1962_v10  ;;  %v1898_v46 = vpack.i.bf16 %v1763_v44, %v1762_v43  ;;  %v1110_v49 = vld [vmem:[%s2121_s26] sm:$0xff]  ;;  %v1112_v50 = vld [vmem:[%s2121_s26 + $0x10] sm:$0xff]  ;;  %v1111_v58 = vld [vmem:[%s2121_s26 + $0x8] sm:$0xff]  ;;  %s600_s12 = scalar_lea.vmem %s2281_s9, %s1711_s29  ;;  %s611_s21 = sadd.s32 %s1713_s14, %s1708_s20 }
  0x1c   : > { %1822 = vperm.xlu1 %1820, %v1814_v6   ;;  %798 = vperm.xlu0 %1813, %v649_v9   ;;  %v663_v51 = vld [vmem:[%s2072_s30 + $0x70] sm:$0xff]  ;;  %v1114_v52 = vld [vmem:[%s2121_s26 + $0x20] sm:$0xff]  ;;  %v1113_v60 = vld [vmem:[%s2121_s26 + $0x18] sm:$0xff]  ;;  %s1714_s27 = sshll.u32 %s611_s21, 2 }
  0x1d   : > { %v1116_v53 = vld [vmem:[%s2121_s26 + $0x30] sm:$0xff]  ;;  %v1283_v54 = vld [vmem:[%s2136_s28] sm:$0xff]  ;;  %v1115_v63 = vld [vmem:[%s2121_s26 + $0x28] sm:$0xff]  ;;  %s613_s30 = scalar_lea.vmem %s2282_s10, %s1714_s27 }
  0x1e   : > { %v1285_v55 = vld [vmem:[%s2136_s28 + $0x10] sm:$0xff]  ;;  %v1390_v56 = vld [vmem:[%s592_s22] sm:$0x7]  ;;  %v1117_v6 = vld [vmem:[%s2121_s26 + $0x38] sm:$0xff] }
  0x1f   : > { %v616_v1 = vld [vmem:[%s549_s25] sm:$0xf]  ;;  %s588_s25 = scalar_lea.vmem %s2279_s7, %s1708_s20 }
  0x20   : > { %1831 = vset.pattern.permute.xlu1 %v1961_v0  ;;  %1827 = vperm.xlu0 %1813, %v1826_v11   ;;  %v749_v4 = vrot.slane %v616_v1, %v748_v61  ;;  %v753_v5 = vrot.slane %v616_v1, %v752_v62  ;;  %v975_v7 = vrot.slane %v616_v1, %v974_v2 }
  0x21   : > { %808 = vperm.xlu1 %1831, %v651_v12   ;;  %v979_v8 = vrot.slane %v616_v1, %v978_v3  ;;  %v1284_v12 = vld [vmem:[%s2136_s28 + $0x8] sm:$0xff] }
  0x22   : > { %v2154_v9 = vrot.slane %v749_v4, %v748_v61 }
  0x24   : > { %813 = vperm.xlu0 %1813, %v652_v16   ;;  %v2159_v16 = vrot.slane %v975_v7, %v974_v2 }
  0x25   : > { %1832 = vset.pattern.permute.xlu1 %v1962_v10 }
  0x26   : > { %1834 = vperm.xlu1 %1832, %v1826_v11  }
  0x28   : > { %1839 = vperm.xlu0 %1813, %v1838_v17  }
  0x2a   : > { %1843 = vset.pattern.permute.xlu1 %v1961_v0 }
  0x2b   : > { %818 = vperm.xlu1 %1843, %v653_v19  }
  0x2c   : > { %823 = vperm.xlu0 %1813, %v654_v22   ;;  %v1286_v22 = vld [vmem:[%s2136_s28 + $0x18] sm:$0xff] }
  0x2f   : > { %1844 = vset.pattern.permute.xlu1 %v1962_v10 }
  0x30   : > { %1846 = vperm.xlu1 %1844, %v1838_v17   ;;  %1851 = vperm.xlu0 %1813, %v1850_v23   ;;  %v2161_v17 = vrot.slane %v979_v8, %v974_v2 }
  0x34   : > { %1855 = vset.pattern.permute.xlu1 %v1961_v0  ;;  %833 = vperm.xlu0 %1813, %v656_v27  }
  0x35   : > { %828 = vperm.xlu1 %1855, %v655_v28  }
  0x38   : > { %1863 = vperm.xlu0 %1813, %v1862_v29  }
  0x39   : > { %1856 = vset.pattern.permute.xlu1 %v1962_v10 }
  0x3a   : > { %1858 = vperm.xlu1 %1856, %v1850_v23  }
  0x3c   : > { %843 = vperm.xlu0 %1813, %v658_v33  }
  0x3e   : > { %1867 = vset.pattern.permute.xlu1 %v1961_v0 }
  0x3f   : > { %838 = vperm.xlu1 %1867, %v657_v34  }
  0x40   : > { %1875 = vperm.xlu0 %1813, %v1874_v35  }
  0x43   : > { %1868 = vset.pattern.permute.xlu1 %v1962_v10 }
  0x44   : > { %1870 = vperm.xlu1 %1868, %v1862_v29   ;;  %853 = vperm.xlu0 %1813, %v660_v39  }
  0x48   : > { %1879 = vset.pattern.permute.xlu1 %v1961_v0  ;;  %1887 = vperm.xlu0 %1813, %v1886_v40  }
  0x49   : > { %848 = vperm.xlu1 %1879, %v659_v42  }
  0x4c   : > { %863 = vperm.xlu0 %1813, %v662_v45  }
  0x4d   : > { %1880 = vset.pattern.permute.xlu1 %v1962_v10 }
  0x4e   : > { %1882 = vperm.xlu1 %1880, %v1874_v35   ;;  %v1443_v35 = vld [vmem:[%s600_s12] sm:$0x7] }
  0x50   : > { %1899 = vperm.xlu0 %1813, %v1898_v46  }
  0x52   : > { %1891 = vset.pattern.permute.xlu1 %v1961_v0 }
  0x53   : > { %858 = vperm.xlu1 %1891, %v661_v47  }
  0x54   : > { %873 = vperm.xlu0 %1813, %v664_v48  }
  0x57   : > { %1892 = vset.pattern.permute.xlu1 %v1962_v10 }
  0x58   : > { %1894 = vperm.xlu1 %1892, %v1886_v40   ;;  %1120 = vperm.xlu0 %1813, %v1110_v49  }
  0x5c   : > { %1903 = vset.pattern.permute.xlu1 %v1961_v0  ;;  %1130 = vperm.xlu0 %1813, %v1112_v50  }
  0x5d   : > { %868 = vperm.xlu1 %1903, %v663_v51  }
  0x60   : > { %1140 = vperm.xlu0 %1813, %v1114_v52  }
  0x61   : > { %1904 = vset.pattern.permute.xlu1 %v1962_v10  ;;  %v2156_v10 = vrot.slane %v753_v5, %v748_v61 }
  0x62   : > { %1906 = vperm.xlu1 %1904, %v1898_v46  }
  0x64   : > { %1150 = vperm.xlu0 %1813, %v1116_v53  }
  0x66   : > { %1910 = vset.pattern.permute.xlu1 %v1961_v0 }
  0x67   : > { %1125 = vperm.xlu1 %1910, %v1111_v58  }
  0x68   : > { %1289 = vperm.xlu0 %1813, %v1283_v54  }
  0x6b   : > { %1135 = vperm.xlu1 %1910, %v1113_v60  }
  0x6c   : > { %1299 = vperm.xlu0 %1813, %v1285_v55  }
  0x6f   : > { %1145 = vperm.xlu1 %1910, %v1115_v63  }
  0x70   : > { %1393 = vperm.xlu0 %1813, %v1390_v56  }
  0x73   : > { %1155 = vperm.xlu1 %1910, %v1117_v6  }
  0x77   : > { %1294 = vperm.xlu1 %1910, %v1284_v12  }
  0x7b   : > { %1304 = vperm.xlu1 %1910, %v1286_v22  }
  0x7f   : > { %1446 = vperm.xlu1 %1910, %v1443_v35  }
  0x96   : > { %v804_v11 = vpop.permute.xlu1 %803 }
  0x97   : > { %v1816_v13 = vpop.permute.xlu0 %1815 }
  0x98   : > { %v1818_v14 = vunpack.i.h.bf16 %v1816_v13  ;;  %v1817_v15 = vunpack.i.l.bf16 %v1816_v13 }
  0x9a   : > { %v766_v18 = vmul.f32 %v1818_v14, %v2154_v9  ;;  %v767_v19 = vmul.f32 %v1818_v14, %v2156_v10  ;;  %v764_v20 = vmul.f32 %v1817_v15, %v2154_v9  ;;  %v765_v21 = vmul.f32 %v1817_v15, %v2156_v10 }
  0x9b   : > { %v1823_v23 = vpop.permute.xlu1 %1822  ;;  %v799_v24 = vpop.permute.xlu0 %798 }
  0x9c   : > { %v1825_v25 = vunpack.i.h.bf16 %v1823_v23  ;;  %v1824_v26 = vunpack.i.l.bf16 %v1823_v23  ;;  %v876_v27 = vadd.f32 %v799_v24, %v764_v20  ;;  %v878_v28 = vadd.f32 %v804_v11, %v766_v18 }
  0x9d   : > { %v877_v29 = vadd.f32 %v799_v24, %v765_v21  ;;  %v879_v30 = vadd.f32 %v804_v11, %v767_v19 }
  0x9e   : > { %v990_v31 = vmul.f32 %v1824_v26, %v2159_v16  ;;  %v991_v32 = vmul.f32 %v1824_v26, %v2161_v17  ;;  %v992_v33 = vmul.f32 %v1825_v25, %v2159_v16  ;;  %v993_v34 = vmul.f32 %v1825_v25, %v2161_v17 }
  0x9f   : > { %v1828_v36 = vpop.permute.xlu0 %1827 }
  0xa0   : > { %v1022_v37 = vadd.f32 %v990_v31, %v876_v27  ;;  %v809_v38 = vpop.permute.xlu1 %808  ;;  %v1830_v39 = vunpack.i.h.bf16 %v1828_v36  ;;  %v1829_v40 = vunpack.i.l.bf16 %v1828_v36  ;;  %v1023_v41 = vadd.f32 %v991_v32, %v877_v29 }
  0xa1   : > { %v1025_v42 = vadd.f32 %v993_v34, %v879_v30  ;;  %v1024_v43 = vadd.f32 %v992_v33, %v878_v28 }
  0xa2   : > { %v768_v44 = vmul.f32 %v1829_v40, %v2154_v9  ;;  %v769_v45 = vmul.f32 %v1829_v40, %v2156_v10  ;;  %v770_v46 = vmul.f32 %v1830_v39, %v2154_v9  ;;  %v771_v47 = vmul.f32 %v1830_v39, %v2156_v10 }
  0xa3   : > { %v814_v48 = vpop.permute.xlu0 %813  ;;  %v1055_v49 = vmax.f32 %v1023_v41, 0.0  ;;  %v1057_v50 = vmax.f32 %v1025_v42, 0.0  ;;  %v1054_v51 = vmax.f32 %v1022_v37, 0.0  ;;  %v1056_v52 = vmax.f32 %v1024_v43, 0.0 }
  0xa4   : > { %v882_v56 = vadd.f32 %v814_v48, %v770_v46  ;;  %v883_v57 = vadd.f32 %v814_v48, %v771_v47  ;;  %v880_v60 = vadd.f32 %v809_v38, %v768_v44  ;;  %v881_v61 = vadd.f32 %v809_v38, %v769_v45 }
  0xa5   : > { %v1835_v53 = vpop.permute.xlu1 %1834  ;;  %v1095_v54 = vpack.c.bf16 %v1057_v50, %v1055_v49  ;;  %v1094_v55 = vpack.c.bf16 %v1056_v52, %v1054_v51 }
  0xa6   : > { %v1837_v58 = vunpack.i.h.bf16 %v1835_v53  ;;  %v1836_v59 = vunpack.i.l.bf16 %v1835_v53 }
  0xa7   : > { %1182 = vmatprep.subr.bf16.mxu0 %v1095_v54  ;;  %v1840_v62 = vpop.permute.xlu0 %1839 }
  0xa8   : > { %v994_v63 = vmul.f32 %v1836_v59, %v2159_v16  ;;  %v995_v1 = vmul.f32 %v1836_v59, %v2161_v17  ;;  %v996_v2 = vmul.f32 %v1837_v58, %v2159_v16  ;;  %v997_v3 = vmul.f32 %v1837_v58, %v2161_v17  ;;  %1183 = vmatpush1.bf16.msra.mxu0 %v1094_v55 }
  0xa9   : > { %v1842_v4 = vunpack.i.h.bf16 %v1840_v62  ;;  %v1841_v5 = vunpack.i.l.bf16 %v1840_v62 }
  0xaa   : > { %v1026_v6 = vadd.f32 %v994_v63, %v880_v60  ;;  %v1027_v7 = vadd.f32 %v995_v1, %v881_v61  ;;  %v1028_v8 = vadd.f32 %v996_v2, %v882_v56  ;;  %v1029_v11 = vadd.f32 %v997_v3, %v883_v57  ;;  %v819_v12 = vpop.permute.xlu1 %818 }
  0xab   : > { %v824_v13 = vpop.permute.xlu0 %823  ;;  %v772_v20 = vmul.f32 %v1841_v5, %v2154_v9  ;;  %v773_v21 = vmul.f32 %v1841_v5, %v2156_v10  ;;  %v774_v22 = vmul.f32 %v1842_v4, %v2154_v9  ;;  %v775_v23 = vmul.f32 %v1842_v4, %v2156_v10 }
  0xac   : > { %v1059_v14 = vmax.f32 %v1027_v7, 0.0  ;;  %v1061_v15 = vmax.f32 %v1029_v11, 0.0  ;;  %v1058_v18 = vmax.f32 %v1026_v6, 0.0  ;;  %v1060_v19 = vmax.f32 %v1028_v8, 0.0 }
  0xad   : > { %v884_v30 = vadd.f32 %v819_v12, %v772_v20  ;;  %v885_v31 = vadd.f32 %v819_v12, %v773_v21  ;;  %v886_v32 = vadd.f32 %v824_v13, %v774_v22  ;;  %v887_v33 = vadd.f32 %v824_v13, %v775_v23 }
  0xae   : > { %v1097_v24 = vpack.c.bf16 %v1061_v15, %v1059_v14  ;;  %v1096_v25 = vpack.c.bf16 %v1060_v19, %v1058_v18 }
  0xaf   : > { %v1847_v26 = vpop.permute.xlu1 %1846  ;;  %v1852_v27 = vpop.permute.xlu0 %1851 }
  0xb0   : > { %v1849_v28 = vunpack.i.h.bf16 %v1847_v26  ;;  %v1848_v29 = vunpack.i.l.bf16 %v1847_v26  ;;  %1184 = vmatprep.subr.bf16.mxu0 %v1097_v24  ;;  %v1854_v38 = vunpack.i.h.bf16 %v1852_v27  ;;  %v1853_v39 = vunpack.i.l.bf16 %v1852_v27 }
  0xb1   : > { %1185 = vmatpush1.bf16.msra.mxu0 %v1096_v25 }
  0xb2   : > { %v998_v34 = vmul.f32 %v1848_v29, %v2159_v16  ;;  %v999_v35 = vmul.f32 %v1848_v29, %v2161_v17  ;;  %v1000_v36 = vmul.f32 %v1849_v28, %v2159_v16  ;;  %v1001_v37 = vmul.f32 %v1849_v28, %v2161_v17 }
  0xb3   : > { %v834_v40 = vpop.permute.xlu0 %833  ;;  %v776_v50 = vmul.f32 %v1853_v39, %v2154_v9  ;;  %v777_v51 = vmul.f32 %v1853_v39, %v2156_v10  ;;  %v778_v52 = vmul.f32 %v1854_v38, %v2154_v9  ;;  %v779_v53 = vmul.f32 %v1854_v38, %v2156_v10 }
  0xb4   : > { %v1030_v41 = vadd.f32 %v998_v34, %v884_v30  ;;  %v1031_v42 = vadd.f32 %v999_v35, %v885_v31  ;;  %v1032_v43 = vadd.f32 %v1000_v36, %v886_v32  ;;  %v1033_v44 = vadd.f32 %v1001_v37, %v887_v33  ;;  %v829_v45 = vpop.permute.xlu1 %828 }
  0xb5   : > { %v888_v60 = vadd.f32 %v829_v45, %v776_v50  ;;  %v889_v61 = vadd.f32 %v829_v45, %v777_v51  ;;  %v890_v62 = vadd.f32 %v834_v40, %v778_v52  ;;  %v891_v63 = vadd.f32 %v834_v40, %v779_v53 }
  0xb6   : > { %v1063_v46 = vmax.f32 %v1031_v42, 0.0  ;;  %v1065_v47 = vmax.f32 %v1033_v44, 0.0  ;;  %v1062_v48 = vmax.f32 %v1030_v41, 0.0  ;;  %v1064_v49 = vmax.f32 %v1032_v43, 0.0 }
  0xb7   : > { %v1864_v54 = vpop.permute.xlu0 %1863 }
  0xb8   : > { %v1099_v55 = vpack.c.bf16 %v1065_v47, %v1063_v46  ;;  %v1098_v56 = vpack.c.bf16 %v1064_v49, %v1062_v48  ;;  %v1866_v6 = vunpack.i.h.bf16 %v1864_v54  ;;  %v1865_v14 = vunpack.i.l.bf16 %v1864_v54 }
  0xb9   : > { %v1859_v57 = vpop.permute.xlu1 %1858 }
  0xba   : > { %v1861_v58 = vunpack.i.h.bf16 %v1859_v57  ;;  %v1860_v59 = vunpack.i.l.bf16 %v1859_v57  ;;  %1186 = vmatprep.subr.bf16.mxu0 %v1099_v55  ;;  %v782_v20 = vmul.f32 %v1866_v6, %v2154_v9  ;;  %v783_v21 = vmul.f32 %v1866_v6, %v2156_v10 }
  0xbb   : > { %1187 = vmatpush1.bf16.msra.mxu0 %v1098_v56  ;;  %v844_v1 = vpop.permute.xlu0 %843  ;;  %v780_v25 = vmul.f32 %v1865_v14, %v2154_v9  ;;  %v781_v26 = vmul.f32 %v1865_v14, %v2156_v10 }
  0xbc   : > { %v1002_v2 = vmul.f32 %v1860_v59, %v2159_v16  ;;  %v1003_v3 = vmul.f32 %v1860_v59, %v2161_v17  ;;  %v1004_v4 = vmul.f32 %v1861_v58, %v2159_v16  ;;  %v1005_v5 = vmul.f32 %v1861_v58, %v2161_v17 }
  0xbd   : > { %v894_v31 = vadd.f32 %v844_v1, %v782_v20  ;;  %v895_v32 = vadd.f32 %v844_v1, %v783_v21 }
  0xbe   : > { %v1034_v7 = vadd.f32 %v1002_v2, %v888_v60  ;;  %v1035_v8 = vadd.f32 %v1003_v3, %v889_v61  ;;  %v1036_v11 = vadd.f32 %v1004_v4, %v890_v62  ;;  %v1037_v12 = vadd.f32 %v1005_v5, %v891_v63  ;;  %v839_v13 = vpop.permute.xlu1 %838 }
  0xbf   : > { %v1876_v15 = vpop.permute.xlu0 %1875  ;;  %v892_v33 = vadd.f32 %v839_v13, %v780_v25  ;;  %v893_v34 = vadd.f32 %v839_v13, %v781_v26 }
  0xc0   : > { %v1067_v18 = vmax.f32 %v1035_v8, 0.0  ;;  %v1069_v19 = vmax.f32 %v1037_v12, 0.0  ;;  %v1066_v22 = vmax.f32 %v1034_v7, 0.0  ;;  %v1068_v23 = vmax.f32 %v1036_v11, 0.0 }
  0xc1   : > { %v1878_v40 = vunpack.i.h.bf16 %v1876_v15  ;;  %v1877_v46 = vunpack.i.l.bf16 %v1876_v15 }
  0xc2   : > { %v1101_v24 = vpack.c.bf16 %v1069_v19, %v1067_v18  ;;  %v1100_v28 = vpack.c.bf16 %v1068_v23, %v1066_v22 }
  0xc3   : > { %v1871_v27 = vpop.permute.xlu1 %1870  ;;  %v854_v39 = vpop.permute.xlu0 %853  ;;  %v786_v51 = vmul.f32 %v1878_v40, %v2154_v9  ;;  %v787_v52 = vmul.f32 %v1878_v40, %v2156_v10  ;;  %v784_v56 = vmul.f32 %v1877_v46, %v2154_v9  ;;  %v785_v57 = vmul.f32 %v1877_v46, %v2156_v10 }
  0xc4   : > { %v1873_v29 = vunpack.i.h.bf16 %v1871_v27  ;;  %v1872_v30 = vunpack.i.l.bf16 %v1871_v27  ;;  %1188 = vmatprep.subr.bf16.mxu0 %v1101_v24 }
  0xc5   : > { %1189 = vmatpush1.bf16.msra.mxu0 %v1100_v28  ;;  %v898_v61 = vadd.f32 %v854_v39, %v786_v51  ;;  %v899_v62 = vadd.f32 %v854_v39, %v787_v52 }
  0xc6   : > { %v1006_v35 = vmul.f32 %v1872_v30, %v2159_v16  ;;  %v1007_v36 = vmul.f32 %v1872_v30, %v2161_v17  ;;  %v1008_v37 = vmul.f32 %v1873_v29, %v2159_v16  ;;  %v1009_v38 = vmul.f32 %v1873_v29, %v2161_v17 }
  0xc7   : > { %v1888_v53 = vpop.permute.xlu0 %1887 }
  0xc8   : > { %v1038_v41 = vadd.f32 %v1006_v35, %v892_v33  ;;  %v1039_v42 = vadd.f32 %v1007_v36, %v893_v34  ;;  %v1040_v43 = vadd.f32 %v1008_v37, %v894_v31  ;;  %v1041_v44 = vadd.f32 %v1009_v38, %v895_v32  ;;  %v849_v45 = vpop.permute.xlu1 %848 }
  0xc9   : > { %v896_v63 = vadd.f32 %v849_v45, %v784_v56  ;;  %v897_v1 = vadd.f32 %v849_v45, %v785_v57  ;;  %v1890_v6 = vunpack.i.h.bf16 %v1888_v53  ;;  %v1889_v15 = vunpack.i.l.bf16 %v1888_v53 }
  0xca   : > { %v1071_v47 = vmax.f32 %v1039_v42, 0.0  ;;  %v1073_v48 = vmax.f32 %v1041_v44, 0.0  ;;  %v1070_v49 = vmax.f32 %v1038_v41, 0.0  ;;  %v1072_v50 = vmax.f32 %v1040_v43, 0.0 }
  0xcb   : > { %v864_v7 = vpop.permute.xlu0 %863  ;;  %v790_v22 = vmul.f32 %v1890_v6, %v2154_v9  ;;  %v791_v23 = vmul.f32 %v1890_v6, %v2156_v10  ;;  %v788_v26 = vmul.f32 %v1889_v15, %v2154_v9  ;;  %v789_v27 = vmul.f32 %v1889_v15, %v2156_v10 }
  0xcc   : > { %v1103_v54 = vpack.c.bf16 %v1073_v48, %v1071_v47  ;;  %v1102_v55 = vpack.c.bf16 %v1072_v50, %v1070_v49 }
  0xcd   : > { %v1883_v58 = vpop.permute.xlu1 %1882  ;;  %v902_v32 = vadd.f32 %v864_v7, %v790_v22  ;;  %v903_v33 = vadd.f32 %v864_v7, %v791_v23 }
  0xce   : > { %v1885_v59 = vunpack.i.h.bf16 %v1883_v58  ;;  %v1884_v60 = vunpack.i.l.bf16 %v1883_v58  ;;  %1190 = vmatprep.subr.bf16.mxu0 %v1103_v54 }
  0xcf   : > { %1191 = vmatpush1.bf16.msra.mxu0 %v1102_v55  ;;  %v1900_v29 = vpop.permute.xlu0 %1899 }
  0xd0   : > { %v1010_v2 = vmul.f32 %v1884_v60, %v2159_v16  ;;  %v1011_v3 = vmul.f32 %v1884_v60, %v2161_v17  ;;  %v1012_v4 = vmul.f32 %v1885_v59, %v2159_v16  ;;  %v1013_v5 = vmul.f32 %v1885_v59, %v2161_v17 }
  0xd1   : > { %v1902_v40 = vunpack.i.h.bf16 %v1900_v29  ;;  %v1901_v46 = vunpack.i.l.bf16 %v1900_v29 }
  0xd2   : > { %v1042_v8 = vadd.f32 %v1010_v2, %v896_v63  ;;  %v1043_v11 = vadd.f32 %v1011_v3, %v897_v1  ;;  %v1044_v12 = vadd.f32 %v1012_v4, %v898_v61  ;;  %v1045_v13 = vadd.f32 %v1013_v5, %v899_v62  ;;  %v859_v14 = vpop.permute.xlu1 %858 }
  0xd3   : > { %v900_v34 = vadd.f32 %v859_v14, %v788_v26  ;;  %v901_v35 = vadd.f32 %v859_v14, %v789_v27  ;;  %v794_v51 = vmul.f32 %v1902_v40, %v2154_v9  ;;  %v795_v52 = vmul.f32 %v1902_v40, %v2156_v10  ;;  %v874_v53 = vpop.permute.xlu0 %873 }
  0xd4   : > { %v1075_v18 = vmax.f32 %v1043_v11, 0.0  ;;  %v1077_v19 = vmax.f32 %v1045_v13, 0.0  ;;  %v1074_v20 = vmax.f32 %v1042_v8, 0.0  ;;  %v1076_v21 = vmax.f32 %v1044_v12, 0.0 }
  0xd5   : > { %v792_v56 = vmul.f32 %v1901_v46, %v2154_v9  ;;  %v793_v57 = vmul.f32 %v1901_v46, %v2156_v10  ;;  %v906_v61 = vadd.f32 %v874_v53, %v794_v51  ;;  %v907_v62 = vadd.f32 %v874_v53, %v795_v52 }
  0xd6   : > { %v1105_v24 = vpack.c.bf16 %v1077_v19, %v1075_v18  ;;  %v1104_v25 = vpack.c.bf16 %v1076_v21, %v1074_v20  ;;  %v1911_v18 = vld [vmem:[%s2084_s23] sm:$0xff]   ;;  %v1914_v19 = vld [vmem:[%s2084_s23 + $0x18] sm:$0xff]  }
  0xd7   : > { %v1895_v28 = vpop.permute.xlu1 %1894  ;;  %v1121_v20 = vpop.permute.xlu0 %1120 }
  0xd8   : > { %v1897_v30 = vunpack.i.h.bf16 %v1895_v28  ;;  %v1896_v31 = vunpack.i.l.bf16 %v1895_v28  ;;  %1192 = vmatprep.subr.bf16.mxu0 %v1105_v24 }
  0xd9   : > { %1193 = vmatpush1.bf16.msra.mxu0 %v1104_v25 }
  0xda   : > { %v1014_v36 = vmul.f32 %v1896_v31, %v2159_v16  ;;  %v1015_v37 = vmul.f32 %v1896_v31, %v2161_v17  ;;  %v1016_v38 = vmul.f32 %v1897_v30, %v2159_v16  ;;  %v1017_v39 = vmul.f32 %v1897_v30, %v2161_v17 }
  0xdc   : > { %v1046_v41 = vadd.f32 %v1014_v36, %v900_v34  ;;  %v1047_v42 = vadd.f32 %v1015_v37, %v901_v35  ;;  %v1048_v43 = vadd.f32 %v1016_v38, %v902_v32  ;;  %v1049_v44 = vadd.f32 %v1017_v39, %v903_v33  ;;  %v869_v45 = vpop.permute.xlu1 %868  ;;  %v1131_v35 = vpop.permute.xlu0 %1130 }
  0xdd   : > { %v904_v63 = vadd.f32 %v869_v45, %v792_v56  ;;  %v905_v1 = vadd.f32 %v869_v45, %v793_v57 }
  0xde   : > { %v1079_v47 = vmax.f32 %v1047_v42, 0.0  ;;  %v1081_v48 = vmax.f32 %v1049_v44, 0.0  ;;  %v1078_v49 = vmax.f32 %v1046_v41, 0.0  ;;  %v1080_v50 = vmax.f32 %v1048_v43, 0.0 }
  0xe0   : > { %v1107_v54 = vpack.c.bf16 %v1081_v48, %v1079_v47  ;;  %v1106_v55 = vpack.c.bf16 %v1080_v50, %v1078_v49  ;;  %v1141_v51 = vpop.permute.xlu0 %1140 }
  0xe1   : > { %v1907_v58 = vpop.permute.xlu1 %1906 }
  0xe2   : > { %v1909_v59 = vunpack.i.h.bf16 %v1907_v58  ;;  %v1908_v60 = vunpack.i.l.bf16 %v1907_v58  ;;  %1194 = vmatprep.subr.bf16.mxu0 %v1107_v54 }
  0xe3   : > { %1195 = vmatpush1.bf16.msra.mxu0 %v1106_v55 }
  0xe4   : > { %v1018_v2 = vmul.f32 %v1908_v60, %v2159_v16  ;;  %v1019_v3 = vmul.f32 %v1908_v60, %v2161_v17  ;;  %v1020_v4 = vmul.f32 %v1909_v59, %v2159_v16  ;;  %v1021_v9 = vmul.f32 %v1909_v59, %v2161_v17  ;;  %v1912_v16 = vld [vmem:[%s2084_s23 + $0x8] sm:$0xff]   ;;  %v1913_v17 = vld [vmem:[%s2084_s23 + $0x10] sm:$0xff]  }
  0xe6   : > { %v1050_v10 = vadd.f32 %v1018_v2, %v904_v63  ;;  %v1051_v5 = vadd.f32 %v1019_v3, %v905_v1  ;;  %v1052_v6 = vadd.f32 %v1020_v4, %v906_v61  ;;  %v1053_v7 = vadd.f32 %v1021_v9, %v907_v62  ;;  %v1126_v24 = vpop.permute.xlu1 %1125  ;;  %v1151_v4 = vpop.permute.xlu0 %1150 }
  0xe8   : > { %v1083_v8 = vmax.f32 %v1051_v5, 0.0  ;;  %v1085_v11 = vmax.f32 %v1053_v7, 0.0  ;;  %v1082_v12 = vmax.f32 %v1050_v10, 0.0  ;;  %v1084_v13 = vmax.f32 %v1052_v6, 0.0 }
  0xea   : > { %v1109_v14 = vpack.c.bf16 %v1085_v11, %v1083_v8  ;;  %v1108_v15 = vpack.c.bf16 %v1084_v13, %v1082_v12  ;;  %v1136_v40 = vpop.permute.xlu1 %1135 }
  0xec   : > { %1196 = vmatprep.subr.bf16.mxu0 %v1109_v14 }
  0xed   : > { %1197 = vmatpush1.bf16.msra.mxu0 %v1108_v15 }
  0xee   : > { %v1146_v56 = vpop.permute.xlu1 %1145 }
  0xf0   : > { %1215 = vmatmul.mubr.bf16.vlgmr.msra.gmra.mrb[0].mxu0 %v1911_v18 }
  0xf1   : > { %1224 = vmatprep.mubr.bf16.mxu0 %v1961_v0 }
  0xf2   : > { %v1156_v7 = vpop.permute.xlu1 %1155 }
  0xf8   : > { %1225 = vmatmul.mubr.bf16.gmra.mrb[4].mxu0 %v1912_v16 }
  0xf9   : > { %1234 = vmatprep.mubr.bf16.mxu0 %v1961_v0 }
 0x100   : > { %1235 = vmatmul.mubr.bf16.gmra.mrb[8].mxu0 %v1913_v17 }
 0x101   : > { %1244 = vmatprep.mubr.bf16.mxu0 %v1961_v0 }
 0x108   : > { %1245 = vmatmul.mubr.bf16.gmra.mrb[12].mxu0 %v1914_v19 }
 0x1c3   : > { %v1216_v21 = vpop.f32.mrb[0].mxu0 }
 0x1c4   : > { %v1217_v22 = vadd.f32 %v1216_v21, %v1121_v20  ;;  %v1218_v23 = vpop.f32.mrb[1].mxu0  ;;  %v1915_v21 = vld [vmem:[%s2243_s11] sm:$0xff]  }
 0x1c5   : > { %v1219_v25 = vadd.f32 %v1218_v23, %v1121_v20  ;;  %v1220_v26 = vpop.f32.mrb[2].mxu0  ;;  %v1290_v23 = vpop.permute.xlu0 %1289 }
 0x1c6   : > { %v1221_v27 = vadd.f32 %v1220_v26, %v1126_v24  ;;  %v1222_v28 = vpop.f32.mrb[3].mxu0  ;;  %v1255_v30 = vmax.f32 %v1217_v22, 0.0  ;;  %v1916_v22 = vld [vmem:[%s2243_s11 + $0x8] sm:$0xff]  }
 0x1c7   : > { %v1223_v29 = vadd.f32 %v1222_v28, %v1126_v24  ;;  %v1256_v32 = vmax.f32 %v1219_v25, 0.0 }
 0x1c8   : > { %v1257_v31 = vmax.f32 %v1221_v27, 0.0  ;;  %v1295_v27 = vpop.permute.xlu1 %1294 }
 0x1c9   : > { %v1258_v33 = vmax.f32 %v1223_v29, 0.0 }
 0x1ca   : > { %v1275_v34 = vpack.c.bf16 %v1257_v31, %v1255_v30 }
 0x1cb   : > { %v1226_v36 = vpop.f32.mrb[4].mxu0  ;;  %v1276_v37 = vpack.c.bf16 %v1258_v33, %v1256_v32 }
 0x1cc   : > { %v1227_v38 = vadd.f32 %v1226_v36, %v1131_v35  ;;  %v1228_v39 = vpop.f32.mrb[5].mxu0 }
 0x1cd   : > { %v1229_v41 = vadd.f32 %v1228_v39, %v1131_v35  ;;  %v1230_v42 = vpop.f32.mrb[6].mxu0  ;;  %1324 = vmatprep.subr.bf16.mxu1 %v1276_v37 }
 0x1ce   : > { %v1231_v43 = vadd.f32 %v1230_v42, %v1136_v40  ;;  %v1232_v44 = vpop.f32.mrb[7].mxu0  ;;  %1325 = vmatpush1.bf16.msra.mxu1 %v1275_v34  ;;  %v1259_v46 = vmax.f32 %v1227_v38, 0.0  ;;  %v1300_v38 = vpop.permute.xlu0 %1299 }
 0x1cf   : > { %v1233_v45 = vadd.f32 %v1232_v44, %v1136_v40  ;;  %v1260_v48 = vmax.f32 %v1229_v41, 0.0  ;;  %v1305_v42 = vpop.permute.xlu1 %1304 }
 0x1d0   : > { %v1261_v47 = vmax.f32 %v1231_v43, 0.0 }
 0x1d1   : > { %v1262_v49 = vmax.f32 %v1233_v45, 0.0 }
 0x1d2   : > { %v1277_v50 = vpack.c.bf16 %v1261_v47, %v1259_v46 }
 0x1d3   : > { %v1278_v52 = vpack.c.bf16 %v1262_v49, %v1260_v48  ;;  %v1236_v53 = vpop.f32.mrb[8].mxu0 }
 0x1d4   : > { %v1237_v54 = vadd.f32 %v1236_v53, %v1141_v51  ;;  %v1238_v55 = vpop.f32.mrb[9].mxu0 }
 0x1d5   : > { %v1239_v57 = vadd.f32 %v1238_v55, %v1141_v51  ;;  %v1240_v58 = vpop.f32.mrb[10].mxu0  ;;  %1326 = vmatprep.subr.bf16.mxu1 %v1278_v52  ;;  %v1394_v55 = vpop.permute.xlu0 %1393 }
 0x1d6   : > { %v1241_v59 = vadd.f32 %v1240_v58, %v1146_v56  ;;  %v1242_v60 = vpop.f32.mrb[11].mxu0  ;;  %1327 = vmatpush1.bf16.msra.mxu1 %v1277_v50  ;;  %v1263_v62 = vmax.f32 %v1237_v54, 0.0  ;;  %v1385_v54 = vld [vmem:[%s588_s25] sm:$0x3] }
 0x1d7   : > { %v1243_v61 = vadd.f32 %v1242_v60, %v1146_v56  ;;  %v1264_v1 = vmax.f32 %v1239_v57, 0.0 }
 0x1d8   : > { %v1265_v63 = vmax.f32 %v1241_v59, 0.0 }
 0x1d9   : > { %v1266_v2 = vmax.f32 %v1243_v61, 0.0 }
 0x1da   : > { %v1279_v3 = vpack.c.bf16 %v1265_v63, %v1263_v62  ;;  %v1447_v63 = vpop.permute.xlu1 %1446 }
 0x1db   : > { %v1280_v9 = vpack.c.bf16 %v1266_v2, %v1264_v1  ;;  %v1246_v10 = vpop.f32.mrb[12].mxu0 }
 0x1dc   : > { %v1247_v5 = vadd.f32 %v1246_v10, %v1151_v4  ;;  %v1248_v6 = vpop.f32.mrb[13].mxu0 }
 0x1dd   : > { %v1249_v8 = vadd.f32 %v1248_v6, %v1151_v4  ;;  %v1250_v11 = vpop.f32.mrb[14].mxu0  ;;  %1328 = vmatprep.subr.bf16.mxu1 %v1280_v9 }
 0x1de   : > { %v1251_v12 = vadd.f32 %v1250_v11, %v1156_v7  ;;  %v1252_v13 = vpop.f32.mrb[15].mxu0  ;;  %1329 = vmatpush1.bf16.msra.mxu1 %v1279_v3  ;;  %v1267_v15 = vmax.f32 %v1247_v5, 0.0 }
 0x1df   : > { %v1253_v14 = vadd.f32 %v1252_v13, %v1156_v7  ;;  %v1268_v16 = vmax.f32 %v1249_v8, 0.0 }
 0x1e0   : > { %v1269_v18 = vmax.f32 %v1251_v12, 0.0 }
 0x1e1   : > { %v1270_v17 = vmax.f32 %v1253_v14, 0.0 }
 0x1e2   : > { %v1281_v19 = vpack.c.bf16 %v1269_v18, %v1267_v15 }
 0x1e3   : > { %v1282_v20 = vpack.c.bf16 %v1270_v17, %v1268_v16 }
 0x1e5   : > { %1330 = vmatprep.subr.bf16.mxu1 %v1282_v20 }
 0x1e6   : > { %1331 = vmatpush1.bf16.msra.mxu1 %v1281_v19 }
 0x1e9   : > { %1721 = vmatmul.mubr.msk.bf16.vlgmr.msra.gmra.mrb[0].mxu1 %vm1317_vm0, %v1915_v21 }
 0x1ea   : > { %1366 = vmatprep.mubr.bf16.mxu1 %v1961_v0 }
 0x1f1   : > { %1722 = vmatmul.mubr.msk.bf16.gmra.mrb[4].mxu1 %vm1317_vm0, %v1916_v22 }
 0x1f2   : > { %1432 = vmatprep.mubr.bf16.mxu1 %v1961_v0 }
 0x2bc   : > { %v1358_v24 = vpop.f32.mrb[0].mxu1 }
 0x2bd   : > { %v1359_v25 = vadd.f32 %v1358_v24, %v1290_v23  ;;  %v1360_v26 = vpop.f32.mrb[1].mxu1 }
 0x2be   : > { %v1361_v28 = vadd.f32 %v1360_v26, %v1290_v23  ;;  %v1362_v29 = vpop.f32.mrb[2].mxu1 }
 0x2bf   : > { %v1363_v30 = vadd.f32 %v1362_v29, %v1295_v27  ;;  %v1364_v31 = vpop.f32.mrb[3].mxu1  ;;  %v1377_v33 = vmax.f32 %v1359_v25, 0.0 }
 0x2c0   : > { %v1365_v32 = vadd.f32 %v1364_v31, %v1295_v27  ;;  %v1378_v35 = vmax.f32 %v1361_v28, 0.0 }
 0x2c1   : > { %v1379_v34 = vmax.f32 %v1363_v30, 0.0 }
 0x2c2   : > { %v1380_v36 = vmax.f32 %v1365_v32, 0.0 }
 0x2c3   : > { %v1386_v37 = vpack.c.bf16 %v1379_v34, %v1377_v33 }
 0x2c4   : > { %v1387_v39 = vpack.c.bf16 %v1380_v36, %v1378_v35  ;;  %v1368_v40 = vpop.f32.mrb[4].mxu1 }
 0x2c5   : > { %v1369_v0 = vadd.f32 %v1368_v40, %v1300_v38  ;;  %v1370_v41 = vpop.f32.mrb[5].mxu1 }
 0x2c6   : > { %v1371_v43 = vadd.f32 %v1370_v41, %v1300_v38  ;;  %v1372_v44 = vpop.f32.mrb[6].mxu1  ;;  %1400 = vmatprep.subr.bf16.mxu1 %v1387_v39 }
 0x2c7   : > { %v1373_v45 = vadd.f32 %v1372_v44, %v1305_v42  ;;  %v1374_v46 = vpop.f32.mrb[7].mxu1  ;;  %1401 = vmatpush1.bf16.msra.mxu1 %v1386_v37  ;;  %v1381_v48 = vmax.f32 %v1369_v0, 0.0 }
 0x2c8   : > { %v1375_v47 = vadd.f32 %v1374_v46, %v1305_v42  ;;  %v1382_v50 = vmax.f32 %v1371_v43, 0.0 }
 0x2c9   : > { %v1383_v49 = vmax.f32 %v1373_v45, 0.0 }
 0x2ca   : > { %v1384_v51 = vmax.f32 %v1375_v47, 0.0 }
 0x2cb   : > { %v1388_v52 = vpack.c.bf16 %v1383_v49, %v1381_v48 }
 0x2cc   : > { %v1389_v53 = vpack.c.bf16 %v1384_v51, %v1382_v50 }
 0x2ce   : > { %1402 = vmatprep.subr.bf16.mxu1 %v1389_v53 }
 0x2cf   : > { %1403 = vmatpush1.bf16.msra.mxu1 %v1388_v52 }
 0x2d2   : > { %1723 = vmatmul.mubr.msk.bf16.vlgmr.msra.gmra.mrb[8].mxu1 %vm1396_vm1, %v1385_v54 }
 0x3a5   : > { %v1434_v56 = vpop.f32.mrb[8].mxu1 }
 0x3a6   : > { %v1435_v57 = vadd.f32 %v1434_v56, %v1394_v55  ;;  %v1436_v58 = vpop.f32.mrb[9].mxu1 }
 0x3a7   : > { %v1437_v59 = vadd.f32 %v1436_v58, %v1394_v55  ;;  %v1438_v60 = vpop.f32.mrb[10].mxu1 }
 0x3a8   : > { %1917 = vtanh.f32 %v1435_v57  ;;  %v1439_v61 = vpop.f32.mrb[11].mxu1 }
 0x3a9   : > { %1919 = vtanh.f32 %v1437_v59 }
 0x3b2   : > { %v1918_v62 = vpop.eup %1917 }
 0x3b3   : > { %v1920_v1 = vpop.eup %1919  ;;  %v1449_v2 = vadd.f32 %v1918_v62, %v1447_v63 }
 0x3b4   : > { %v1450_v3 = vadd.f32 %v1920_v1, %v1447_v63 }
 0x3b6   : > { %v1453_v4 = vcombine.low %v1449_v2, %v1450_v3 }
 0x3b8   : > { %1455 = vst [vmem:[%s613_s30] sm:$0x77] %v1453_v4 }
 0x3b9 PF: > { %s20_s17 = sadd.s32 1, %s1959_s17   ;;  %s2283_s13 = smov %s1951_s15 }
 0x3ba   : > { %p17_p7 = scmp.ge.s32.totalorder %s20_s17, 10   ;;  %s2284_s14 = smov %s1955_s16 }
 0x3bb   : > { %s2285_s15 = smov %s2288_s18  ;;  %s2286_s16 = smov %s2292_s19 }
 0x3bc   :  { %19 = sbr.rel (!%p17_p7) target bundleno = 3 (0x3), region = 117 }

</bundles_post_ra>
